<compile_context>
chip_gen: v6e
topology: v6e:2x2x1
jax: 0.10.0
libtpu: 0.0.40
codegen_flags: <defaults>
</compile_context>

<pallas_src>
import jax
import jax.numpy as jnp
from jax.experimental import pallas as pl
from jax.experimental.pallas import tpu as pltpu

HIDDEN = 256
SUBLANE = 16    # batch-tile granularity (multiple of 8 for f32, 16 for bf16)
FC5_ROWS = 8    # w5^T zero-padded to 8 sublane rows for an aligned MXU pass


def critic_kernel(s_ref, a_ref,
                  w1_ref, b1_ref, w2_ref, b2_ref,
                  w3x_ref, w3a_ref, b3_ref,
                  w4_ref, b4_ref, w5t_ref, b5_ref,
                  o_ref):
    """One batch tile: all five layers fused; activations never leave VMEM."""
    cdt = w1_ref.dtype          # MXU operand dtype (bf16 default, f32 optional)
    f32 = jnp.float32

    # fc1 + relu  (MXU in cdt, f32 accumulate; bias/ReLU in f32 on the VPU)
    x = jnp.dot(s_ref[...].astype(cdt), w1_ref[...], preferred_element_type=f32)
    x = jnp.maximum(x + b1_ref[...], 0.0)
    # fc2 + relu
    x = jnp.dot(x.astype(cdt), w2_ref[...], preferred_element_type=f32)
    x = jnp.maximum(x + b2_ref[...], 0.0)
    # fc3 on cat([x, action]) + relu  (concat fused via split weight)
    x = (jnp.dot(x.astype(cdt), w3x_ref[...], preferred_element_type=f32)
         + jnp.dot(a_ref[...].astype(cdt), w3a_ref[...], preferred_element_type=f32))
    x = jnp.maximum(x + b3_ref[...], 0.0)
    # fc4 + relu
    x = jnp.dot(x.astype(cdt), w4_ref[...], preferred_element_type=f32)
    x = jnp.maximum(x + b4_ref[...], 0.0)
    # fc5: q[t] = sum_k w5[k] * x[t, k] + b5, computed as a B-transposed
    # matmul (lhs = w5^T padded to 8 rows, contract both last dims) so the
    # per-tile Q values land lane-dense as row 0 of an (8, TB) result.
    q8 = jax.lax.dot_general(
        w5t_ref[...], x.astype(cdt),
        dimension_numbers=(((1,), (1,)), ((), ())),
        preferred_element_type=f32)                       # (FC5_ROWS, TB)
    o_ref[...] = (q8[0:1, :] + b5_ref[...])[None]         # (1, 1, TB)


def _round_up(x, m):
    return ((x + m - 1) // m) * m


def critic_forward(state, action, params, *, block_batch=1024,
                   compute_dtype=jnp.bfloat16):
    """state: [B, S] f32, action: [B, A] f32 -> q: [B, 1] f32."""
    B, S = state.shape
    A = action.shape[1]
    (w1, b1, w2, b2, w3x, w3a, b3, w4, b4, w5, b5) = params

    # ---- parameter prep ----------------------------------------------------
    # Weights go through the MXU in `compute_dtype`; biases stay f32 for the
    # f32 VPU epilogue (v5e has no bf16 VPU).
    w1c, w2c, w3xc, w3ac, w4c = (w.astype(compute_dtype)
                                 for w in (w1, w2, w3x, w3a, w4))
    # fc5 weight as [FC5_ROWS, 256]: row 0 = w5^T, rows 1..7 zero.
    w5t = jnp.pad(w5.T, ((0, FC5_ROWS - 1), (0, 0))).astype(compute_dtype)
    b5r = jnp.reshape(b5, (1, 1)).astype(jnp.float32)

    # ---- batch tiling -------------------------------------------------------
    block_batch = max(SUBLANE, _round_up(block_batch, SUBLANE))
    b_rounded = _round_up(B, SUBLANE)
    # Cap TB so the grid has >=2 steps whenever the batch allows it (keeps
    # both v7x TensorCores busy via the "parallel" axis; no-op on v5e/v6e).
    TB = min(block_batch,
             max(SUBLANE, _round_up(pl.cdiv(b_rounded, 2), SUBLANE)))
    Bp = _round_up(B, TB)
    if Bp != B:
        state = jnp.pad(state, ((0, Bp - B), (0, 0)))
        action = jnp.pad(action, ((0, Bp - B), (0, 0)))
    n_tiles = Bp // TB

    def resident(arr):
        # Full-array block + constant index_map: block index never changes, so
        # Pallas keeps the tensor resident in VMEM (no per-tile re-DMA).
        return pl.BlockSpec(arr.shape, lambda i: (0, 0))

    in_specs = [
        pl.BlockSpec((TB, S), lambda i: (i, 0)),   # state tile
        pl.BlockSpec((TB, A), lambda i: (i, 0)),   # action tile
        resident(w1c), resident(b1),
        resident(w2c), resident(b2),
        resident(w3xc), resident(w3ac), resident(b3),
        resident(w4c), resident(b4),
        resident(w5t), resident(b5r),
    ]
    operands = (state, action, w1c, b1, w2c, b2, w3xc, w3ac, b3,
                w4c, b4, w5t, b5r)

    flops = 2 * Bp * (S * HIDDEN + 3 * HIDDEN * HIDDEN + A * HIDDEN
                      + FC5_ROWS * HIDDEN)
    bytes_accessed = int(sum(int(x.size) * x.dtype.itemsize for x in operands)
                         + Bp * 4)  # + Q output

    out = pl.pallas_call(
        critic_kernel,
        out_shape=jax.ShapeDtypeStruct((n_tiles, 1, TB), jnp.float32),
        grid=(n_tiles,),
        in_specs=in_specs,
        out_specs=pl.BlockSpec((1, 1, TB), lambda i: (i, 0, 0)),
        compiler_params=pltpu.CompilerParams(
            dimension_semantics=("parallel",),
            vmem_limit_bytes=32 * 1024 * 1024),
        cost_estimate=pl.CostEstimate(
            flops=flops, transcendentals=0, bytes_accessed=bytes_accessed),
    )(*operands)

    # (n_tiles, 1, TB) -> flat length-Bp Q vector -> [B, 1]
    return out.reshape(Bp)[:B].reshape(B, 1)


def init_params(key, state_typesize, action_typesize):
    """Deterministic synthetic parameter init (PyTorch Linear shapes, stored
    transposed as [in, out]; biases stored as [1, out] for broadcasting)."""
    ks = jax.random.split(key, 10)

    def linear(kw, kb, fan_in, fan_out):
        lim = 1.0 / jnp.sqrt(fan_in)
        w = jax.random.uniform(kw, (fan_in, fan_out), jnp.float32, -lim, lim)
        b = jax.random.uniform(kb, (1, fan_out), jnp.float32, -lim, lim)
        return w, b

    w1, b1 = linear(ks[0], ks[1], state_typesize, HIDDEN)
    w2, b2 = linear(ks[2], ks[3], HIDDEN, HIDDEN)
    # fc3 takes cat([x, action]) of width HIDDEN + action_typesize
    w3_full, b3 = linear(ks[4], ks[5], HIDDEN + action_typesize, HIDDEN)
    w3x, w3a = w3_full[:HIDDEN, :], w3_full[HIDDEN:, :]
    w4, b4 = linear(ks[6], ks[7], HIDDEN, HIDDEN)
    w5, b5 = linear(ks[8], ks[9], HIDDEN, 1)
    return (w1, b1, w2, b2, w3x, w3a, b3, w4, b4, w5, b5)


def critic_reference(state, action, params, compute_dtype=jnp.float32):
    """Pure-JAX reference; can mimic the kernel's bf16 operand casts."""
    (w1, b1, w2, b2, w3x, w3a, b3, w4, b4, w5, b5) = params

    def mm(a, w):
        return jax.lax.dot(a.astype(compute_dtype), w.astype(compute_dtype),
                           preferred_element_type=jnp.float32)

    x = jax.nn.relu(mm(state, w1) + b1)
    x = jax.nn.relu(mm(x, w2) + b2)
    x = jax.nn.relu(mm(x, w3x) + mm(action, w3a) + b3)
    x = jax.nn.relu(mm(x, w4) + b4)
    return mm(x, w5) + b5


if __name__ == "__main__":
    STATE_SIZE = 16
    ACTION_SIZE = 8

    key = jax.random.PRNGKey(0)
    k_params, k_state, k_action = jax.random.split(key, 3)
    params = init_params(k_params, STATE_SIZE, ACTION_SIZE)

    # 1) Small batch, f32 MXU operands: exact check against the f32 reference.
    B1 = 8
    state = jax.random.normal(k_state, (B1, STATE_SIZE), jnp.float32)
    action = jax.random.normal(k_action, (B1, ACTION_SIZE), jnp.float32)
    q = jax.block_until_ready(
        critic_forward(state, action, params, compute_dtype=jnp.float32))
    q_ref = critic_reference(state, action, params)
    assert q.shape == (B1, 1)
    assert jnp.allclose(q, q_ref, atol=1e-4, rtol=1e-4), \
        float(jnp.max(jnp.abs(q - q_ref)))

    # 2) Non-multiple batch, bf16 MXU operands (the fast path), multi-step
    #    grid: exercises batch padding, resident weights, pipelining, and the
    #    lane-dense fc5 output path.
    B2 = 200
    state2 = jax.random.normal(jax.random.PRNGKey(1), (B2, STATE_SIZE), jnp.float32)
    action2 = jax.random.normal(jax.random.PRNGKey(2), (B2, ACTION_SIZE), jnp.float32)
    q2 = jax.block_until_ready(
        critic_forward(state2, action2, params, block_batch=64))
    q2_ref_bf16 = critic_reference(state2, action2, params,
                                   compute_dtype=jnp.bfloat16)
    q2_ref_f32 = critic_reference(state2, action2, params)
    assert q2.shape == (B2, 1)
    assert jnp.allclose(q2, q2_ref_bf16, atol=1e-2, rtol=1e-2), \
        float(jnp.max(jnp.abs(q2 - q2_ref_bf16)))
    assert jnp.allclose(q2, q2_ref_f32, atol=5e-2, rtol=5e-2), \
        float(jnp.max(jnp.abs(q2 - q2_ref_f32)))

    print("KERNEL_OK")
</pallas_src>

<mosaic_0001>
module attributes {stable_mosaic.version = 11 : i64} {
  func.func @critic_kernel(%arg0: i32, %arg1: memref<16x16xf32, #tpu.memory_space<vmem>>, %arg2: memref<16x8xf32, #tpu.memory_space<vmem>>, %arg3: memref<16x256xf32, #tpu.memory_space<vmem>>, %arg4: memref<1x256xf32, #tpu.memory_space<vmem>>, %arg5: memref<256x256xf32, #tpu.memory_space<vmem>>, %arg6: memref<1x256xf32, #tpu.memory_space<vmem>>, %arg7: memref<256x256xf32, #tpu.memory_space<vmem>>, %arg8: memref<8x256xf32, #tpu.memory_space<vmem>>, %arg9: memref<1x256xf32, #tpu.memory_space<vmem>>, %arg10: memref<256x256xf32, #tpu.memory_space<vmem>>, %arg11: memref<1x256xf32, #tpu.memory_space<vmem>>, %arg12: memref<8x256xf32, #tpu.memory_space<vmem>>, %arg13: memref<1x1xf32, #tpu.memory_space<vmem>>, %arg14: memref<1x1x16xf32, #tpu.memory_space<vmem>>) attributes {dimension_semantics = [#tpu.dimension_semantics<parallel>], iteration_bounds = array<i64: 1>, scalar_prefetch = 0 : i64, scratch_operands = 0 : i64, tpu.core_type = #tpu.core_type<tc>, window_params = [{transform_indices = @transform_0, window_bounds = array<i64: 16, 16>}, {transform_indices = @transform_1, window_bounds = array<i64: 16, 8>}, {pipeline_mode = #tpu.pipeline_mode<synchronous>, transform_indices = @transform_2, window_bounds = array<i64: 16, 256>}, {pipeline_mode = #tpu.pipeline_mode<synchronous>, transform_indices = @transform_3, window_bounds = array<i64: 1, 256>}, {pipeline_mode = #tpu.pipeline_mode<synchronous>, transform_indices = @transform_4, window_bounds = array<i64: 256, 256>}, {pipeline_mode = #tpu.pipeline_mode<synchronous>, transform_indices = @transform_5, window_bounds = array<i64: 1, 256>}, {pipeline_mode = #tpu.pipeline_mode<synchronous>, transform_indices = @transform_6, window_bounds = array<i64: 256, 256>}, {pipeline_mode = #tpu.pipeline_mode<synchronous>, transform_indices = @transform_7, window_bounds = array<i64: 8, 256>}, {pipeline_mode = #tpu.pipeline_mode<synchronous>, transform_indices = @transform_8, window_bounds = array<i64: 1, 256>}, {pipeline_mode = #tpu.pipeline_mode<synchronous>, transform_indices = @transform_9, window_bounds = array<i64: 256, 256>}, {pipeline_mode = #tpu.pipeline_mode<synchronous>, transform_indices = @transform_10, window_bounds = array<i64: 1, 256>}, {pipeline_mode = #tpu.pipeline_mode<synchronous>, transform_indices = @transform_11, window_bounds = array<i64: 8, 256>}, {pipeline_mode = #tpu.pipeline_mode<synchronous>, transform_indices = @transform_12, window_bounds = array<i64: 1, 1>}, {transform_indices = @transform_13, window_bounds = array<i64: 1, 1, 16>}]} {
    %c0 = arith.constant 0 : index
    %c0_0 = arith.constant 0 : index
    %0 = vector.load %arg1[%c0, %c0_0] : memref<16x16xf32, #tpu.memory_space<vmem>>, vector<16x16xf32>
    %c0_1 = arith.constant 0 : index
    %c0_2 = arith.constant 0 : index
    %1 = vector.load %arg3[%c0_1, %c0_2] : memref<16x256xf32, #tpu.memory_space<vmem>>, vector<16x256xf32>
    %cst = arith.constant dense<0.000000e+00> : vector<16x256xf32>
    %2 = tpu.matmul %0, %1, %cst {dimension_numbers = #tpu.dot_dimension_numbers<[1], [0], [0], [1], [0, 0, 1, 1], [], []>} : vector<16x16xf32>, vector<16x256xf32>, vector<16x256xf32> -> vector<16x256xf32>
    %c0_3 = arith.constant 0 : index
    %c0_4 = arith.constant 0 : index
    %3 = vector.load %arg4[%c0_3, %c0_4] : memref<1x256xf32, #tpu.memory_space<vmem>>, vector<1x256xf32>
    %4 = vector.broadcast %3 : vector<1x256xf32> to vector<16x256xf32>
    %5 = arith.addf %2, %4 : vector<16x256xf32>
    %cst_5 = arith.constant 0.000000e+00 : f32
    %6 = vector.broadcast %cst_5 : f32 to vector<16x256xf32>
    %7 = arith.maximumf %5, %6 : vector<16x256xf32>
    %c0_6 = arith.constant 0 : index
    %c0_7 = arith.constant 0 : index
    %8 = vector.load %arg5[%c0_6, %c0_7] : memref<256x256xf32, #tpu.memory_space<vmem>>, vector<256x256xf32>
    %cst_8 = arith.constant dense<0.000000e+00> : vector<16x256xf32>
    %9 = tpu.matmul %7, %8, %cst_8 {dimension_numbers = #tpu.dot_dimension_numbers<[1], [0], [0], [1], [0, 0, 1, 1], [], []>} : vector<16x256xf32>, vector<256x256xf32>, vector<16x256xf32> -> vector<16x256xf32>
    %c0_9 = arith.constant 0 : index
    %c0_10 = arith.constant 0 : index
    %10 = vector.load %arg6[%c0_9, %c0_10] : memref<1x256xf32, #tpu.memory_space<vmem>>, vector<1x256xf32>
    %11 = vector.broadcast %10 : vector<1x256xf32> to vector<16x256xf32>
    %12 = arith.addf %9, %11 : vector<16x256xf32>
    %cst_11 = arith.constant 0.000000e+00 : f32
    %13 = vector.broadcast %cst_11 : f32 to vector<16x256xf32>
    %14 = arith.maximumf %12, %13 : vector<16x256xf32>
    %c0_12 = arith.constant 0 : index
    %c0_13 = arith.constant 0 : index
    %15 = vector.load %arg7[%c0_12, %c0_13] : memref<256x256xf32, #tpu.memory_space<vmem>>, vector<256x256xf32>
    %cst_14 = arith.constant dense<0.000000e+00> : vector<16x256xf32>
    %16 = tpu.matmul %14, %15, %cst_14 {dimension_numbers = #tpu.dot_dimension_numbers<[1], [0], [0], [1], [0, 0, 1, 1], [], []>} : vector<16x256xf32>, vector<256x256xf32>, vector<16x256xf32> -> vector<16x256xf32>
    %c0_15 = arith.constant 0 : index
    %c0_16 = arith.constant 0 : index
    %17 = vector.load %arg2[%c0_15, %c0_16] : memref<16x8xf32, #tpu.memory_space<vmem>>, vector<16x8xf32>
    %c0_17 = arith.constant 0 : index
    %c0_18 = arith.constant 0 : index
    %18 = vector.load %arg8[%c0_17, %c0_18] : memref<8x256xf32, #tpu.memory_space<vmem>>, vector<8x256xf32>
    %cst_19 = arith.constant dense<0.000000e+00> : vector<16x256xf32>
    %19 = tpu.matmul %17, %18, %cst_19 {dimension_numbers = #tpu.dot_dimension_numbers<[1], [0], [0], [1], [0, 0, 1, 1], [], []>} : vector<16x8xf32>, vector<8x256xf32>, vector<16x256xf32> -> vector<16x256xf32>
    %20 = arith.addf %16, %19 : vector<16x256xf32>
    %c0_20 = arith.constant 0 : index
    %c0_21 = arith.constant 0 : index
    %21 = vector.load %arg9[%c0_20, %c0_21] : memref<1x256xf32, #tpu.memory_space<vmem>>, vector<1x256xf32>
    %22 = vector.broadcast %21 : vector<1x256xf32> to vector<16x256xf32>
    %23 = arith.addf %20, %22 : vector<16x256xf32>
    %cst_22 = arith.constant 0.000000e+00 : f32
    %24 = vector.broadcast %cst_22 : f32 to vector<16x256xf32>
    %25 = arith.maximumf %23, %24 : vector<16x256xf32>
    %c0_23 = arith.constant 0 : index
    %c0_24 = arith.constant 0 : index
    %26 = vector.load %arg10[%c0_23, %c0_24] : memref<256x256xf32, #tpu.memory_space<vmem>>, vector<256x256xf32>
    %cst_25 = arith.constant dense<0.000000e+00> : vector<16x256xf32>
    %27 = tpu.matmul %25, %26, %cst_25 {dimension_numbers = #tpu.dot_dimension_numbers<[1], [0], [0], [1], [0, 0, 1, 1], [], []>} : vector<16x256xf32>, vector<256x256xf32>, vector<16x256xf32> -> vector<16x256xf32>
    %c0_26 = arith.constant 0 : index
    %c0_27 = arith.constant 0 : index
    %28 = vector.load %arg11[%c0_26, %c0_27] : memref<1x256xf32, #tpu.memory_space<vmem>>, vector<1x256xf32>
    %29 = vector.broadcast %28 : vector<1x256xf32> to vector<16x256xf32>
    %30 = arith.addf %27, %29 : vector<16x256xf32>
    %cst_28 = arith.constant 0.000000e+00 : f32
    %31 = vector.broadcast %cst_28 : f32 to vector<16x256xf32>
    %32 = arith.maximumf %30, %31 : vector<16x256xf32>
    %c0_29 = arith.constant 0 : index
    %c0_30 = arith.constant 0 : index
    %33 = vector.load %arg12[%c0_29, %c0_30] : memref<8x256xf32, #tpu.memory_space<vmem>>, vector<8x256xf32>
    %cst_31 = arith.constant dense<0.000000e+00> : vector<8x16xf32>
    %34 = tpu.matmul %33, %32, %cst_31 {dimension_numbers = #tpu.dot_dimension_numbers<[1], [1], [0], [0], [0, 0, 1, 0], [], []>} : vector<8x256xf32>, vector<16x256xf32>, vector<8x16xf32> -> vector<8x16xf32>
    %35 = vector.extract_strided_slice %34 {offsets = [0, 0], sizes = [1, 16], strides = [1, 1]} : vector<8x16xf32> to vector<1x16xf32>
    %c0_32 = arith.constant 0 : index
    %c0_33 = arith.constant 0 : index
    %36 = vector.load %arg13[%c0_32, %c0_33] : memref<1x1xf32, #tpu.memory_space<vmem>>, vector<1x1xf32>
    %37 = vector.broadcast %36 : vector<1x1xf32> to vector<1x16xf32>
    %38 = arith.addf %35, %37 : vector<1x16xf32>
    %39 = vector.shape_cast %38 : vector<1x16xf32> to vector<1x1x16xf32>
    %c0_34 = arith.constant 0 : index
    %c0_35 = arith.constant 0 : index
    %c0_36 = arith.constant 0 : index
    %40 = vector.load %arg14[%c0_34, %c0_35, %c0_36] : memref<1x1x16xf32, #tpu.memory_space<vmem>>, vector<1x1x16xf32>
    tpu.vector_store %arg14[%c0_34, %c0_35, %c0_36], %39 {strides = array<i32>} : memref<1x1x16xf32, #tpu.memory_space<vmem>>, vector<1x1x16xf32>,
    return
  }
  func.func @transform_0(%arg0: i32) -> (i32, i32) {
    %c0_i32 = arith.constant 0 : i32
    %c0_i32_0 = arith.constant 0 : i32
    return %arg0, %c0_i32 : i32, i32
  }
  func.func @transform_1(%arg0: i32) -> (i32, i32) {
    %c0_i32 = arith.constant 0 : i32
    %c0_i32_0 = arith.constant 0 : i32
    return %arg0, %c0_i32 : i32, i32
  }
  func.func @transform_2(%arg0: i32) -> (i32, i32) {
    %c0_i32 = arith.constant 0 : i32
    %c0_i32_0 = arith.constant 0 : i32
    %c0_i32_1 = arith.constant 0 : i32
    return %c0_i32, %c0_i32_0 : i32, i32
  }
  func.func @transform_3(%arg0: i32) -> (i32, i32) {
    %c0_i32 = arith.constant 0 : i32
    %c0_i32_0 = arith.constant 0 : i32
    %c0_i32_1 = arith.constant 0 : i32
    return %c0_i32, %c0_i32_0 : i32, i32
  }
  func.func @transform_4(%arg0: i32) -> (i32, i32) {
    %c0_i32 = arith.constant 0 : i32
    %c0_i32_0 = arith.constant 0 : i32
    %c0_i32_1 = arith.constant 0 : i32
    return %c0_i32, %c0_i32_0 : i32, i32
  }
  func.func @transform_5(%arg0: i32) -> (i32, i32) {
    %c0_i32 = arith.constant 0 : i32
    %c0_i32_0 = arith.constant 0 : i32
    %c0_i32_1 = arith.constant 0 : i32
    return %c0_i32, %c0_i32_0 : i32, i32
  }
  func.func @transform_6(%arg0: i32) -> (i32, i32) {
    %c0_i32 = arith.constant 0 : i32
    %c0_i32_0 = arith.constant 0 : i32
    %c0_i32_1 = arith.constant 0 : i32
    return %c0_i32, %c0_i32_0 : i32, i32
  }
  func.func @transform_7(%arg0: i32) -> (i32, i32) {
    %c0_i32 = arith.constant 0 : i32
    %c0_i32_0 = arith.constant 0 : i32
    %c0_i32_1 = arith.constant 0 : i32
    return %c0_i32, %c0_i32_0 : i32, i32
  }
  func.func @transform_8(%arg0: i32) -> (i32, i32) {
    %c0_i32 = arith.constant 0 : i32
    %c0_i32_0 = arith.constant 0 : i32
    %c0_i32_1 = arith.constant 0 : i32
    return %c0_i32, %c0_i32_0 : i32, i32
  }
  func.func @transform_9(%arg0: i32) -> (i32, i32) {
    %c0_i32 = arith.constant 0 : i32
    %c0_i32_0 = arith.constant 0 : i32
    %c0_i32_1 = arith.constant 0 : i32
    return %c0_i32, %c0_i32_0 : i32, i32
  }
  func.func @transform_10(%arg0: i32) -> (i32, i32) {
    %c0_i32 = arith.constant 0 : i32
    %c0_i32_0 = arith.constant 0 : i32
    %c0_i32_1 = arith.constant 0 : i32
    return %c0_i32, %c0_i32_0 : i32, i32
  }
  func.func @transform_11(%arg0: i32) -> (i32, i32) {
    %c0_i32 = arith.constant 0 : i32
    %c0_i32_0 = arith.constant 0 : i32
    %c0_i32_1 = arith.constant 0 : i32
    return %c0_i32, %c0_i32_0 : i32, i32
  }
  func.func @transform_12(%arg0: i32) -> (i32, i32) {
    %c0_i32 = arith.constant 0 : i32
    %c0_i32_0 = arith.constant 0 : i32
    %c0_i32_1 = arith.constant 0 : i32
    return %c0_i32, %c0_i32_0 : i32, i32
  }
  func.func @transform_13(%arg0: i32) -> (i32, i32, i32) {
    %c0_i32 = arith.constant 0 : i32
    %c0_i32_0 = arith.constant 0 : i32
    %c0_i32_1 = arith.constant 0 : i32
    return %arg0, %c0_i32, %c0_i32_0 : i32, i32, i32
  }
}

</mosaic_0001>

<bundles_post_ra>
// kernel: tpu_custom_call.1
= control target key start
LH: loop header
LB: loop body
LE: loop exit
PB: predicated region body
PF: predicated region fallthrough
CT: control target
= control target key end

     0   :  { %s1228_s0 = inlined_call_operand.vmem [shape: f32[16,16], index: 0, kind: input, shape index: {}]   ;;  %s1229_s1 = inlined_call_operand.vmem [shape: f32[16,8], index: 1, kind: input, shape index: {}]   ;;  %s1230_s2 = inlined_call_operand.hbm [shape: f32[16,256], index: 2, kind: input, shape index: {}]   ;;  %s1231_s3 = inlined_call_operand.hbm [shape: f32[1,256], index: 3, kind: input, shape index: {}]   ;;  %s1232_s4 = inlined_call_operand.hbm [shape: f32[256,256], index: 4, kind: input, shape index: {}]   ;;  %s1233_s5 = inlined_call_operand.vmem [shape: f32[1,256], index: 5, kind: input, shape index: {}]   ;;  %s1234_s6 = inlined_call_operand.hbm [shape: f32[256,256], index: 6, kind: input, shape index: {}]   ;;  %s1235_s7 = inlined_call_operand.vmem [shape: f32[8,256], index: 7, kind: input, shape index: {}]   ;;  %s1236_s8 = inlined_call_operand.vmem [shape: f32[1,256], index: 8, kind: input, shape index: {}]   ;;  %s1237_s9 = inlined_call_operand.hbm [shape: f32[256,256], index: 9, kind: input, shape index: {}]   ;;  %s1238_s10 = inlined_call_operand.vmem [shape: f32[1,256], index: 10, kind: input, shape index: {}]   ;;  %s1239_s11 = inlined_call_operand.hbm [shape: f32[8,256], index: 11, kind: input, shape index: {}]   ;;  %s1240_s12 = inlined_call_operand.<no memory space> [shape: f32[1,1], index: 12, kind: input, shape index: {}]   ;;  %s1241_s13 = inlined_call_operand.hbm [shape: f32[1,1,16], index: 13, kind: output, shape index: {}]  }
   0x1   :  { %v18_v0 = vstv %s1240_s12 }
   0x2   :  { %19 = vst [vmem:[#allocation2] sm:$0x1] %v18_v0 }
   0x3   :  { %20 = vsyncpa [#allocation4], 0 }
   0x4   :  { %21 = vsyncpa [#allocation7], 0 }
   0x5   :  { %22 = vsyncpa [#allocation10], 0 }
   0x6   :  { %23 = vsyncpa [#allocation13], 0 }
   0x7   :  { %24 = vsyncpa [#allocation5], 0  ;;  %s1063_s27 = smov [#allocation6]  }
   0x8   :  { %s47_s28 = sshll.u32 %s1063_s27, 4  ;;  %s48_s28 = int_to_ptr.vmem [resolvable:$true] %s47_s28 }
   0x9   :  { %s921_s29 = scalar_lea.vmem %s48_s28, 32  ;;  %p926_p1 = scmp.lt.s32.totalorder %s48_s28, %s48_s28 }
   0xa   :  { %p922_p0 = scmp.ne.s32.totalorder %s48_s28, %s921_s29  ;;  %p927_p2 = scmp.lt.s32.totalorder %s921_s29, %s921_s29 }
   0xc   :  { %p928_p3 = por %p927_p2, %p926_p1 }
   0xe   :  { %p929_p4 = pnand %p928_p3, %p922_p0 }
  0x10   :  { %932 = shalt.err (!%p929_p4)
}
  0x11   :  { %50 = dma.hbm_to_vmem [thread:$0]  %s1231_s3, 32, %s48_s28, [#allocation7]  }
  0x12   :  { %s1064_s12 = smov [#allocation9]   ;;  %s1065_s16 = smov [#allocation3]  }
  0x13   :  { %s70_s15 = sshll.u32 %s1064_s12, 4  ;;  %s34_s17 = sshll.u32 %s1065_s16, 4  ;;  %s71_s15 = int_to_ptr.vmem [resolvable:$true] %s70_s15  ;;  %s35_s17 = int_to_ptr.vmem [resolvable:$true] %s34_s17 }
  0x14   :  { %s941_s18 = scalar_lea.vmem %s71_s15, 8192  ;;  %p946_p6 = scmp.lt.s32.totalorder %s71_s15, %s71_s15 }
  0x15   :  { %p942_p5 = scmp.ne.s32.totalorder %s71_s15, %s941_s18  ;;  %p947_p7 = scmp.lt.s32.totalorder %s941_s18, %s941_s18 }
  0x17   :  { %p948_p8 = por %p947_p7, %p946_p6 }
  0x19   :  { %p949_p9 = pnand %p948_p8, %p942_p5 }
  0x1b   :  { %952 = shalt.err (!%p949_p9)
}
  0x1c   :  { %s1066_s19 = smov 256   ;;  %s1067_s20 = smov 16  }
  0x1d   :  { %76 = dma.hbm_to_vmem [thread:$0]  %s1234_s6, 8192, %s71_s15, [#allocation10], %s1066_s19, %s1066_s19, %s1067_s20  }
  0x1e   :  { %s961_s3 = scalar_lea.vmem %s35_s17, 512  ;;  %p966_p11 = scmp.lt.s32.totalorder %s35_s17, %s35_s17 }
  0x1f   :  { %p962_p10 = scmp.ne.s32.totalorder %s35_s17, %s961_s3  ;;  %p967_p12 = scmp.lt.s32.totalorder %s961_s3, %s961_s3 }
  0x21   :  { %p968_p13 = por %p967_p12, %p966_p11 }
  0x23   :  { %p969_p0 = pnand %p968_p13, %p962_p10 }
  0x25   :  { %972 = shalt.err (!%p969_p0)
}
  0x26   :  { %40 = dma.hbm_to_vmem [thread:$0]  %s1230_s2, 512, %s35_s17, [#allocation4], %s1066_s19, %s1066_s19, %s1067_s20  }
  0x27   :  { %s1068_s25 = smov [#allocation8]   ;;  %s1069_s27 = smov [#allocation11]  }
  0x28   :  { %s56_s26 = sshll.u32 %s1068_s25, 4  ;;  %s86_s6 = sshll.u32 %s1069_s27, 4  ;;  %s57_s26 = int_to_ptr.vmem [resolvable:$true] %s56_s26  ;;  %s87_s6 = int_to_ptr.vmem [resolvable:$true] %s86_s6 }
  0x29   :  { %s981_s28 = scalar_lea.vmem %s57_s26, 8192  ;;  %p986_p2 = scmp.lt.s32.totalorder %s57_s26, %s57_s26 }
  0x2a   :  { %p982_p1 = scmp.ne.s32.totalorder %s57_s26, %s981_s28  ;;  %p987_p3 = scmp.lt.s32.totalorder %s981_s28, %s981_s28 }
  0x2c   :  { %p988_p4 = por %p987_p3, %p986_p2 }
  0x2e   :  { %p989_p5 = pnand %p988_p4, %p982_p1 }
  0x30   :  { %992 = shalt.err (!%p989_p5)
}
  0x31   :  { %62 = dma.hbm_to_vmem [thread:$0]  %s1232_s4, 8192, %s57_s26, [#allocation7], %s1066_s19, %s1066_s19, %s1067_s20  }
  0x32   :  { %s1001_s2 = scalar_lea.vmem %s87_s6, 8192  ;;  %p1006_p7 = scmp.lt.s32.totalorder %s87_s6, %s87_s6 }
  0x33   :  { %p1002_p6 = scmp.ne.s32.totalorder %s87_s6, %s1001_s2  ;;  %p1007_p8 = scmp.lt.s32.totalorder %s1001_s2, %s1001_s2 }
  0x35   :  { %p1008_p9 = por %p1007_p8, %p1006_p7 }
  0x37   :  { %p1009_p10 = pnand %p1008_p9, %p1002_p6 }
  0x39   :  { %1012 = shalt.err (!%p1009_p10)
}
  0x3a   :  { %92 = dma.hbm_to_vmem [thread:$0]  %s1237_s9, 8192, %s87_s6, [#allocation10], %s1066_s19, %s1066_s19, %s1067_s20  }
  0x3b   :  { %s1070_s15 = smov [#allocation12]  }
  0x3c   :  { %s101_s16 = sshll.u32 %s1070_s15, 4  ;;  %s102_s16 = int_to_ptr.vmem [resolvable:$true] %s101_s16 }
  0x3d   :  { %s1021_s17 = scalar_lea.vmem %s102_s16, 256  ;;  %p1026_p12 = scmp.lt.s32.totalorder %s102_s16, %s102_s16 }
  0x3e   :  { %p1022_p11 = scmp.ne.s32.totalorder %s102_s16, %s1021_s17  ;;  %p1027_p13 = scmp.lt.s32.totalorder %s1021_s17, %s1021_s17 }
  0x40   :  { %p1028_p0 = por %p1027_p13, %p1026_p12 }
  0x42   :  { %p1029_p1 = pnand %p1028_p0, %p1022_p11 }
  0x44   :  { %1032 = shalt.err (!%p1029_p1)
}
  0x45   :  { %104 = dma.hbm_to_vmem [thread:$0]  %s1239_s11, 256, %s102_s16, [#allocation13]  }
  0x46   :  { %1053 = dma.done.wait [#allocation4], 512  }
  0x47   :  { %1054 = vsyncadd [#allocation4], 4294966784 }
  0x48   :  { %1055 = dma.done.wait [#allocation7], 8224  }
  0x49   :  { %1056 = vsyncadd [#allocation7], 4294959072 }
  0x4a   :  { %1057 = dma.done.wait [#allocation10], 16384  }
  0x4b   :  { %1058 = vsyncadd [#allocation10], 4294950912 }
  0x4c   :  { %1059 = dma.done.wait [#allocation13], 256  }
  0x4d   :  { %1060 = vsyncadd [#allocation13], 4294967040  ;;  %v1071_v1 = vmov 0.0   ;;  %v130_v2 = vld [vmem:[#allocation3 + $0x18] sm:$0xff]  ;;  %v129_v3 = vld [vmem:[#allocation3 + $0x10] sm:$0xff]  ;;  %vm143_vm0 = vcmask 130048  }
  0x4e   :  { %214 = vmatprep.mubr.f32.mxu0 %v1071_v1  ;;  %v128_v4 = vld [vmem:[#allocation3 + $0x8] sm:$0xff]  ;;  %178 = vmatprep.subr.mxu0 %v130_v2  ;;  %v127_v5 = vld [vmem:[#allocation3] sm:$0xff]  ;;  %v261_v8 = vld [vmem:[#allocation8 + $0xf0] sm:$0xff]  ;;  %vm456_vm1 = vcmask 64512   ;;  %vm877_vm2 = vcmask 122880  }
  0x4f   :  { %v125_v6 = vld [vmem:[%s1228_s0] sm:$0xff]  ;;  %179 = vmatpush1.msra.mxu0 %v129_v3  ;;  %v260_v9 = vld [vmem:[#allocation8 + $0xe8] sm:$0xff]  ;;  %v257_v12 = vld [vmem:[#allocation8 + $0xd0] sm:$0xff] }
  0x50   :  { %v262_v7 = vld [vmem:[#allocation8 + $0xf8] sm:$0xff]  ;;  %180 = vmatprep.subr.mxu0 %v128_v4  ;;  %v259_v10 = vld [vmem:[#allocation8 + $0xe0] sm:$0xff]  ;;  %v256_v14 = vld [vmem:[#allocation8 + $0xc8] sm:$0xff] }
  0x51   :  { %307 = vmatprep.subr.mxu1 %v262_v7  ;;  %181 = vmatpush1.msra.mxu0 %v127_v5  ;;  %v258_v11 = vld [vmem:[#allocation8 + $0xd8] sm:$0xff]  ;;  %v126_v13 = vld [vmem:[%s1228_s0 + $0x8] sm:$0xff]  ;;  %v253_v17 = vld [vmem:[#allocation8 + $0xb0] sm:$0xff] }
  0x52   :  { %308 = vmatpush1.msra.mxu1 %v261_v8  ;;  %897 = vmatmul.mubr.msk.f32.vlgmr.msra.gmra.mxu0 %vm143_vm0, %v125_v6  ;;  %v255_v15 = vld [vmem:[#allocation8 + $0xc0] sm:$0xff]  ;;  %v254_v16 = vld [vmem:[#allocation8 + $0xb8] sm:$0xff]  ;;  %v252_v18 = vld [vmem:[#allocation8 + $0xa8] sm:$0xff] }
  0x53   :  { %309 = vmatprep.subr.mxu1 %v260_v9  ;;  %220 = vmatprep.mubr.f32.mxu0 %v1071_v1  ;;  %v251_v19 = vld [vmem:[#allocation8 + $0xa0] sm:$0xff]  ;;  %v250_v20 = vld [vmem:[#allocation8 + $0x98] sm:$0xff]  ;;  %v249_v21 = vld [vmem:[#allocation8 + $0x90] sm:$0xff] }
  0x54   :  { %310 = vmatpush1.msra.mxu1 %v259_v10  ;;  %v248_v22 = vld [vmem:[#allocation8 + $0x88] sm:$0xff]  ;;  %v247_v23 = vld [vmem:[#allocation8 + $0x80] sm:$0xff]  ;;  %v246_v24 = vld [vmem:[#allocation8 + $0x78] sm:$0xff] }
  0x55   :  { %311 = vmatprep.subr.mxu1 %v258_v11  ;;  %v245_v25 = vld [vmem:[#allocation8 + $0x70] sm:$0xff]  ;;  %v244_v26 = vld [vmem:[#allocation8 + $0x68] sm:$0xff]  ;;  %v243_v27 = vld [vmem:[#allocation8 + $0x60] sm:$0xff] }
  0x56   :  { %312 = vmatpush1.msra.mxu1 %v257_v12  ;;  %898 = vmatmul.mubr.msk.f32.gmra.mxu0 %vm143_vm0, %v126_v13  ;;  %v242_v28 = vld [vmem:[#allocation8 + $0x58] sm:$0xff]  ;;  %v241_v29 = vld [vmem:[#allocation8 + $0x50] sm:$0xff]  ;;  %v240_v30 = vld [vmem:[#allocation8 + $0x48] sm:$0xff] }
  0x57   :  { %313 = vmatprep.subr.mxu1 %v256_v14  ;;  %527 = vmatprep.mubr.f32.mxu0 %v1071_v1  ;;  %v239_v31 = vld [vmem:[#allocation8 + $0x40] sm:$0xff]  ;;  %v238_v32 = vld [vmem:[#allocation8 + $0x38] sm:$0xff]  ;;  %v237_v33 = vld [vmem:[#allocation8 + $0x30] sm:$0xff] }
  0x58   :  { %314 = vmatpush1.msra.mxu1 %v255_v15  ;;  %v236_v34 = vld [vmem:[#allocation8 + $0x28] sm:$0xff]  ;;  %v235_v35 = vld [vmem:[#allocation8 + $0x20] sm:$0xff]  ;;  %v234_v36 = vld [vmem:[#allocation8 + $0x18] sm:$0xff] }
  0x59   :  { %315 = vmatprep.subr.mxu1 %v254_v16  ;;  %v233_v37 = vld [vmem:[#allocation8 + $0x10] sm:$0xff]  ;;  %v232_v38 = vld [vmem:[#allocation8 + $0x8] sm:$0xff]  ;;  %v231_v39 = vld [vmem:[#allocation8] sm:$0xff] }
  0x5a   :  { %316 = vmatpush1.msra.mxu1 %v253_v17  ;;  %v294_v40 = vld [vmem:[#allocation8 + $0x1f8] sm:$0xff]  ;;  %v293_v41 = vld [vmem:[#allocation8 + $0x1f0] sm:$0xff]  ;;  %v292_v42 = vld [vmem:[#allocation8 + $0x1e8] sm:$0xff] }
  0x5b   :  { %317 = vmatprep.subr.mxu1 %v252_v18  ;;  %v291_v43 = vld [vmem:[#allocation8 + $0x1e0] sm:$0xff]  ;;  %v290_v44 = vld [vmem:[#allocation8 + $0x1d8] sm:$0xff]  ;;  %v289_v45 = vld [vmem:[#allocation8 + $0x1d0] sm:$0xff] }
  0x5c   :  { %318 = vmatpush1.msra.mxu1 %v251_v19  ;;  %v288_v46 = vld [vmem:[#allocation8 + $0x1c8] sm:$0xff]  ;;  %v287_v47 = vld [vmem:[#allocation8 + $0x1c0] sm:$0xff]  ;;  %v286_v48 = vld [vmem:[#allocation8 + $0x1b8] sm:$0xff] }
  0x5d   :  { %319 = vmatprep.subr.mxu1 %v250_v20  ;;  %v285_v49 = vld [vmem:[#allocation8 + $0x1b0] sm:$0xff]  ;;  %v284_v50 = vld [vmem:[#allocation8 + $0x1a8] sm:$0xff]  ;;  %v283_v51 = vld [vmem:[#allocation8 + $0x1a0] sm:$0xff] }
  0x5e   :  { %320 = vmatpush1.msra.mxu1 %v249_v21  ;;  %v282_v52 = vld [vmem:[#allocation8 + $0x198] sm:$0xff]  ;;  %v281_v53 = vld [vmem:[#allocation8 + $0x190] sm:$0xff]  ;;  %v280_v54 = vld [vmem:[#allocation8 + $0x188] sm:$0xff] }
  0x5f   :  { %321 = vmatprep.subr.mxu1 %v248_v22  ;;  %v279_v55 = vld [vmem:[#allocation8 + $0x180] sm:$0xff]  ;;  %v278_v56 = vld [vmem:[#allocation8 + $0x178] sm:$0xff]  ;;  %v277_v57 = vld [vmem:[#allocation8 + $0x170] sm:$0xff] }
  0x60   :  { %322 = vmatpush1.msra.mxu1 %v247_v23  ;;  %v276_v58 = vld [vmem:[#allocation8 + $0x168] sm:$0xff]  ;;  %v275_v59 = vld [vmem:[#allocation8 + $0x160] sm:$0xff]  ;;  %v274_v60 = vld [vmem:[#allocation8 + $0x158] sm:$0xff] }
  0x61   :  { %323 = vmatprep.subr.mxu1 %v246_v24  ;;  %v273_v61 = vld [vmem:[#allocation8 + $0x150] sm:$0xff]  ;;  %v272_v62 = vld [vmem:[#allocation8 + $0x148] sm:$0xff]  ;;  %v271_v63 = vld [vmem:[#allocation8 + $0x140] sm:$0xff] }
  0x62   :  { %324 = vmatpush1.msra.mxu1 %v245_v25  ;;  %v270_v0 = vld [vmem:[#allocation8 + $0x138] sm:$0xff]  ;;  %v269_v2 = vld [vmem:[#allocation8 + $0x130] sm:$0xff]  ;;  %v268_v3 = vld [vmem:[#allocation8 + $0x128] sm:$0xff] }
  0x63   :  { %325 = vmatprep.subr.mxu1 %v244_v26  ;;  %v267_v4 = vld [vmem:[#allocation8 + $0x120] sm:$0xff]  ;;  %v266_v5 = vld [vmem:[#allocation8 + $0x118] sm:$0xff]  ;;  %v265_v6 = vld [vmem:[#allocation8 + $0x110] sm:$0xff] }
  0x64   :  { %326 = vmatpush1.msra.mxu1 %v243_v27  ;;  %v264_v7 = vld [vmem:[#allocation8 + $0x108] sm:$0xff]  ;;  %v263_v8 = vld [vmem:[#allocation8 + $0x100] sm:$0xff]  ;;  %v419_v12 = vld [vmem:[#allocation9 + $0xf8] sm:$0xff] }
  0x65   :  { %327 = vmatprep.subr.mxu1 %v242_v28  ;;  %v455_v9 = vld [vmem:[%s1235_s7 + $0x8] sm:$0xff]  ;;  %v454_v10 = vld [vmem:[%s1235_s7] sm:$0xff]  ;;  %v418_v13 = vld [vmem:[#allocation9 + $0xf0] sm:$0xff] }
  0x66   :  { %328 = vmatpush1.msra.mxu1 %v241_v29  ;;  %v452_v11 = vld [vmem:[%s1229_s1] sm:$0xff]  ;;  %493 = vmatprep.subr.mxu0 %v455_v9  ;;  %v417_v14 = vld [vmem:[#allocation9 + $0xe8] sm:$0xff]  ;;  %v414_v17 = vld [vmem:[#allocation9 + $0xd0] sm:$0xff] }
  0x67   :  { %329 = vmatprep.subr.mxu1 %v240_v30  ;;  %494 = vmatpush1.msra.mxu0 %v454_v10  ;;  %v416_v15 = vld [vmem:[#allocation9 + $0xe0] sm:$0xff]  ;;  %v415_v16 = vld [vmem:[#allocation9 + $0xd8] sm:$0xff]  ;;  %v413_v18 = vld [vmem:[#allocation9 + $0xc8] sm:$0xff] }
  0x68   :  { %330 = vmatpush1.msra.mxu1 %v239_v31  ;;  %899 = vmatmul.mubr.msk.f32.vlgmr.msra.gmra.mxu0 %vm456_vm1, %v452_v11  ;;  %v412_v19 = vld [vmem:[#allocation9 + $0xc0] sm:$0xff]  ;;  %v411_v20 = vld [vmem:[#allocation9 + $0xb8] sm:$0xff]  ;;  %v410_v21 = vld [vmem:[#allocation9 + $0xb0] sm:$0xff] }
  0x69   :  { %331 = vmatprep.subr.mxu1 %v238_v32  ;;  %540 = vmatprep.subr.mxu0 %v419_v12  ;;  %v409_v22 = vld [vmem:[#allocation9 + $0xa8] sm:$0xff]  ;;  %v408_v23 = vld [vmem:[#allocation9 + $0xa0] sm:$0xff]  ;;  %v407_v24 = vld [vmem:[#allocation9 + $0x98] sm:$0xff] }
  0x6a   :  { %332 = vmatpush1.msra.mxu1 %v237_v33  ;;  %541 = vmatpush1.msra.mxu0 %v418_v13  ;;  %v406_v25 = vld [vmem:[#allocation9 + $0x90] sm:$0xff]  ;;  %v404_v26 = vld [vmem:[#allocation9 + $0x80] sm:$0xff]  ;;  %v403_v27 = vld [vmem:[#allocation9 + $0x78] sm:$0xff] }
  0x6b   :  { %333 = vmatprep.subr.mxu1 %v236_v34  ;;  %533 = vmatprep.mubr.f32.mxu0 %v1071_v1  ;;  %v405_v1 = vld [vmem:[#allocation9 + $0x88] sm:$0xff]  ;;  %v402_v28 = vld [vmem:[#allocation9 + $0x70] sm:$0xff]  ;;  %v400_v30 = vld [vmem:[#allocation9 + $0x60] sm:$0xff] }
  0x6c   :  { %334 = vmatpush1.msra.mxu1 %v235_v35  ;;  %542 = vmatprep.subr.mxu0 %v417_v14  ;;  %v401_v29 = vld [vmem:[#allocation9 + $0x68] sm:$0xff]  ;;  %v399_v31 = vld [vmem:[#allocation9 + $0x58] sm:$0xff]  ;;  %v398_v32 = vld [vmem:[#allocation9 + $0x50] sm:$0xff] }
  0x6d   :  { %335 = vmatprep.subr.mxu1 %v234_v36  ;;  %543 = vmatpush1.msra.mxu0 %v416_v15  ;;  %v397_v33 = vld [vmem:[#allocation9 + $0x48] sm:$0xff]  ;;  %v396_v34 = vld [vmem:[#allocation9 + $0x40] sm:$0xff]  ;;  %v395_v35 = vld [vmem:[#allocation9 + $0x38] sm:$0xff] }
  0x6e   :  { %336 = vmatpush1.msra.mxu1 %v233_v37  ;;  %544 = vmatprep.subr.mxu0 %v415_v16  ;;  %v394_v36 = vld [vmem:[#allocation9 + $0x30] sm:$0xff]  ;;  %v393_v37 = vld [vmem:[#allocation9 + $0x28] sm:$0xff] }
  0x6f   :  { %337 = vmatprep.subr.mxu1 %v232_v38  ;;  %545 = vmatpush1.msra.mxu0 %v414_v17  ;;  %v392_v38 = vld [vmem:[#allocation9 + $0x20] sm:$0xff] }
  0x70   :  { %338 = vmatpush1.msra.mxu1 %v231_v39  ;;  %546 = vmatprep.subr.mxu0 %v413_v18  ;;  %v391_v39 = vld [vmem:[#allocation9 + $0x18] sm:$0xff] }
  0x71   :  { %339 = vmatprep.subr.mxu1 %v294_v40  ;;  %547 = vmatpush1.msra.mxu0 %v412_v19  ;;  %v390_v40 = vld [vmem:[#allocation9 + $0x10] sm:$0xff] }
  0x72   :  { %340 = vmatpush2.msra.mxu1 %v293_v41  ;;  %548 = vmatprep.subr.mxu0 %v411_v20  ;;  %v389_v41 = vld [vmem:[#allocation9 + $0x8] sm:$0xff] }
  0x73   :  { %341 = vmatprep.subr.mxu1 %v292_v42  ;;  %549 = vmatpush1.msra.mxu0 %v410_v21  ;;  %v388_v42 = vld [vmem:[#allocation9] sm:$0xff] }
  0x74   :  { %342 = vmatpush2.msra.mxu1 %v291_v43  ;;  %550 = vmatprep.subr.mxu0 %v409_v22  ;;  %v451_v43 = vld [vmem:[#allocation9 + $0x1f8] sm:$0xff] }
  0x75   :  { %343 = vmatprep.subr.mxu1 %v290_v44  ;;  %551 = vmatpush1.msra.mxu0 %v408_v23  ;;  %v450_v44 = vld [vmem:[#allocation9 + $0x1f0] sm:$0xff]  ;;  %v427_v23 = vld [vmem:[#allocation9 + $0x138] sm:$0xff] }
  0x76   :  { %344 = vmatpush2.msra.mxu1 %v289_v45  ;;  %552 = vmatprep.subr.mxu0 %v407_v24  ;;  %v449_v45 = vld [vmem:[#allocation9 + $0x1e8] sm:$0xff]  ;;  %v426_v24 = vld [vmem:[#allocation9 + $0x130] sm:$0xff] }
  0x77   :  { %345 = vmatprep.subr.mxu1 %v288_v46  ;;  %553 = vmatpush1.msra.mxu0 %v406_v25  ;;  %v448_v46 = vld [vmem:[#allocation9 + $0x1e0] sm:$0xff] }
  0x78   :  { %346 = vmatpush2.msra.mxu1 %v287_v47  ;;  %554 = vmatprep.subr.mxu0 %v405_v1  ;;  %v447_v47 = vld [vmem:[#allocation9 + $0x1d8] sm:$0xff]  ;;  %v453_v25 = vld [vmem:[%s1229_s1 + $0x8] sm:$0xff] }
  0x79   :  { %347 = vmatprep.subr.mxu1 %v286_v48  ;;  %555 = vmatpush1.msra.mxu0 %v404_v26  ;;  %v446_v48 = vld [vmem:[#allocation9 + $0x1d0] sm:$0xff]  ;;  %v425_v1 = vld [vmem:[#allocation9 + $0x128] sm:$0xff]  ;;  %v424_v26 = vld [vmem:[#allocation9 + $0x120] sm:$0xff] }
  0x7a   :  { %348 = vmatpush2.msra.mxu1 %v285_v49  ;;  %556 = vmatprep.subr.mxu0 %v403_v27  ;;  %v445_v49 = vld [vmem:[#allocation9 + $0x1c8] sm:$0xff]  ;;  %v423_v27 = vld [vmem:[#allocation9 + $0x118] sm:$0xff] }
  0x7b   :  { %349 = vmatprep.subr.mxu1 %v284_v50  ;;  %557 = vmatpush1.msra.mxu0 %v402_v28  ;;  %v444_v50 = vld [vmem:[#allocation9 + $0x1c0] sm:$0xff]  ;;  %v422_v28 = vld [vmem:[#allocation9 + $0x110] sm:$0xff] }
  0x7c   :  { %350 = vmatpush2.msra.mxu1 %v283_v51  ;;  %558 = vmatprep.subr.mxu0 %v401_v29  ;;  %v443_v51 = vld [vmem:[#allocation9 + $0x1b8] sm:$0xff]  ;;  %v421_v29 = vld [vmem:[#allocation9 + $0x108] sm:$0xff] }
  0x7d   :  { %351 = vmatprep.subr.mxu1 %v282_v52  ;;  %559 = vmatpush1.msra.mxu0 %v400_v30  ;;  %v442_v52 = vld [vmem:[#allocation9 + $0x1b0] sm:$0xff]  ;;  %v420_v30 = vld [vmem:[#allocation9 + $0x100] sm:$0xff] }
  0x7e   :  { %352 = vmatpush2.msra.mxu1 %v281_v53  ;;  %560 = vmatprep.subr.mxu0 %v399_v31  ;;  %v441_v53 = vld [vmem:[#allocation9 + $0x1a8] sm:$0xff]  ;;  %v668_v31 = vld [vmem:[#allocation11 + $0xf8] sm:$0xff] }
  0x7f   :  { %353 = vmatprep.subr.mxu1 %v280_v54  ;;  %561 = vmatpush1.msra.mxu0 %v398_v32  ;;  %v440_v54 = vld [vmem:[#allocation9 + $0x1a0] sm:$0xff]  ;;  %v667_v32 = vld [vmem:[#allocation11 + $0xf0] sm:$0xff] }
  0x80   :  { %354 = vmatpush2.msra.mxu1 %v279_v55  ;;  %562 = vmatprep.subr.mxu0 %v397_v33  ;;  %v439_v55 = vld [vmem:[#allocation9 + $0x198] sm:$0xff]  ;;  %v666_v33 = vld [vmem:[#allocation11 + $0xe8] sm:$0xff] }
  0x81   :  { %355 = vmatprep.subr.mxu1 %v278_v56  ;;  %563 = vmatpush1.msra.mxu0 %v396_v34  ;;  %v438_v56 = vld [vmem:[#allocation9 + $0x190] sm:$0xff]  ;;  %v665_v34 = vld [vmem:[#allocation11 + $0xe0] sm:$0xff] }
  0x82   :  { %356 = vmatpush2.msra.mxu1 %v277_v57  ;;  %564 = vmatprep.subr.mxu0 %v395_v35  ;;  %v437_v57 = vld [vmem:[#allocation9 + $0x188] sm:$0xff]  ;;  %v664_v35 = vld [vmem:[#allocation11 + $0xd8] sm:$0xff] }
  0x83   :  { %357 = vmatprep.subr.mxu1 %v276_v58  ;;  %565 = vmatpush1.msra.mxu0 %v394_v36  ;;  %v436_v58 = vld [vmem:[#allocation9 + $0x180] sm:$0xff]  ;;  %v663_v36 = vld [vmem:[#allocation11 + $0xd0] sm:$0xff] }
  0x84   :  { %358 = vmatpush2.msra.mxu1 %v275_v59  ;;  %566 = vmatprep.subr.mxu0 %v393_v37  ;;  %v435_v59 = vld [vmem:[#allocation9 + $0x178] sm:$0xff]  ;;  %v662_v37 = vld [vmem:[#allocation11 + $0xc8] sm:$0xff] }
  0x85   :  { %359 = vmatprep.subr.mxu1 %v274_v60  ;;  %567 = vmatpush1.msra.mxu0 %v392_v38  ;;  %v434_v60 = vld [vmem:[#allocation9 + $0x170] sm:$0xff]  ;;  %v661_v38 = vld [vmem:[#allocation11 + $0xc0] sm:$0xff] }
  0x86   :  { %360 = vmatpush2.msra.mxu1 %v273_v61  ;;  %568 = vmatprep.subr.mxu0 %v391_v39  ;;  %v433_v61 = vld [vmem:[#allocation9 + $0x168] sm:$0xff]  ;;  %v660_v39 = vld [vmem:[#allocation11 + $0xb8] sm:$0xff] }
  0x87   :  { %361 = vmatprep.subr.mxu1 %v272_v62  ;;  %569 = vmatpush1.msra.mxu0 %v390_v40  ;;  %v432_v62 = vld [vmem:[#allocation9 + $0x160] sm:$0xff]  ;;  %v659_v40 = vld [vmem:[#allocation11 + $0xb0] sm:$0xff] }
  0x88   :  { %362 = vmatpush2.msra.mxu1 %v271_v63  ;;  %570 = vmatprep.subr.mxu0 %v389_v41  ;;  %v431_v63 = vld [vmem:[#allocation9 + $0x158] sm:$0xff]  ;;  %v658_v41 = vld [vmem:[#allocation11 + $0xa8] sm:$0xff] }
  0x89   :  { %363 = vmatprep.subr.mxu1 %v270_v0  ;;  %571 = vmatpush1.msra.mxu0 %v388_v42  ;;  %v430_v0 = vld [vmem:[#allocation9 + $0x150] sm:$0xff]  ;;  %v657_v42 = vld [vmem:[#allocation11 + $0xa0] sm:$0xff] }
  0x8a   :  { %364 = vmatpush2.msra.mxu1 %v269_v2  ;;  %572 = vmatprep.subr.mxu0 %v451_v43  ;;  %v429_v2 = vld [vmem:[#allocation9 + $0x148] sm:$0xff]  ;;  %v656_v43 = vld [vmem:[#allocation11 + $0x98] sm:$0xff] }
  0x8b   :  { %365 = vmatprep.subr.mxu1 %v268_v3  ;;  %573 = vmatpush2.msra.mxu0 %v450_v44  ;;  %v428_v3 = vld [vmem:[#allocation9 + $0x140] sm:$0xff]  ;;  %v655_v44 = vld [vmem:[#allocation11 + $0x90] sm:$0xff] }
  0x8c   :  { %366 = vmatpush2.msra.mxu1 %v267_v4  ;;  %574 = vmatprep.subr.mxu0 %v449_v45  ;;  %v133_v4 = vlaneseq  ;;  %v654_v45 = vld [vmem:[#allocation11 + $0x88] sm:$0xff] }
  0x8d   :  { %367 = vmatprep.subr.mxu1 %v266_v5  ;;  %575 = vmatpush2.msra.mxu0 %v448_v46  ;;  %v653_v46 = vld [vmem:[#allocation11 + $0x80] sm:$0xff] }
  0x8e   :  { %368 = vmatpush2.msra.mxu1 %v265_v6  ;;  %576 = vmatprep.subr.mxu0 %v447_v47  ;;  %v134_v5 = vshrl.u32 %v133_v4, 7  ;;  %v652_v47 = vld [vmem:[#allocation11 + $0x78] sm:$0xff] }
  0x8f   :  { %369 = vmatprep.subr.mxu1 %v264_v7  ;;  %577 = vmatpush2.msra.mxu0 %v446_v48  ;;  %v131_v7 = vld [vmem:[#allocation6] sm:$0x3]  ;;  %v651_v48 = vld [vmem:[#allocation11 + $0x70] sm:$0xff] }
  0x90   :  { %370 = vmatpush2.msra.mxu1 %v263_v8  ;;  %578 = vmatprep.subr.mxu0 %v445_v49  ;;  %v1199_v6 = vsub.s32 0, %v134_v5  ;;  %v1201_v8 = vsub.s32 1, %v134_v5  ;;  %v650_v49 = vld [vmem:[#allocation11 + $0x68] sm:$0xff]  ;;  %v696_v4 = vld [vmem:[#allocation11 + $0x1d8] sm:$0xff]  ;;  %v695_v5 = vld [vmem:[#allocation11 + $0x1d0] sm:$0xff] }
  0x91   :  { %579 = vmatpush2.msra.mxu0 %v444_v50  ;;  %713 = vmatprep.subr.mxu1 %v668_v31  ;;  %v649_v50 = vld [vmem:[#allocation11 + $0x60] sm:$0xff] }
  0x92   :  { %580 = vmatprep.subr.mxu0 %v443_v51  ;;  %v136_v9 = vrot.slane %v131_v7, %v1199_v6  ;;  %v140_v10 = vrot.slane %v131_v7, %v1201_v8  ;;  %900 = vmatmul.mubr.msk.f32.gmra.mxu0 %vm456_vm1, %v453_v25  ;;  %v648_v51 = vld [vmem:[#allocation11 + $0x58] sm:$0xff]  ;;  %v694_v7 = vld [vmem:[#allocation11 + $0x1c8] sm:$0xff] }
  0x93   :  { %581 = vmatpush2.msra.mxu0 %v442_v52  ;;  %v647_v52 = vld [vmem:[#allocation11 + $0x50] sm:$0xff] }
  0x94   :  { %582 = vmatprep.subr.mxu0 %v441_v53  ;;  %v646_v53 = vld [vmem:[#allocation11 + $0x48] sm:$0xff] }
  0x95   :  { %583 = vmatpush2.msra.mxu0 %v440_v54  ;;  %v645_v54 = vld [vmem:[#allocation11 + $0x40] sm:$0xff] }
  0x96   :  { %584 = vmatprep.subr.mxu0 %v439_v55  ;;  %v644_v55 = vld [vmem:[#allocation11 + $0x38] sm:$0xff] }
  0x97   :  { %585 = vmatpush2.msra.mxu0 %v438_v56  ;;  %v643_v56 = vld [vmem:[#allocation11 + $0x30] sm:$0xff] }
  0x98   :  { %586 = vmatprep.subr.mxu0 %v437_v57  ;;  %v642_v57 = vld [vmem:[#allocation11 + $0x28] sm:$0xff] }
  0x99   :  { %587 = vmatpush2.msra.mxu0 %v436_v58  ;;  %v641_v58 = vld [vmem:[#allocation11 + $0x20] sm:$0xff] }
  0x9a   :  { %588 = vmatprep.subr.mxu0 %v435_v59  ;;  %v640_v59 = vld [vmem:[#allocation11 + $0x18] sm:$0xff] }
  0x9b   :  { %589 = vmatpush2.msra.mxu0 %v434_v60  ;;  %v639_v60 = vld [vmem:[#allocation11 + $0x10] sm:$0xff] }
  0x9c   :  { %590 = vmatprep.subr.mxu0 %v433_v61  ;;  %v638_v61 = vld [vmem:[#allocation11 + $0x8] sm:$0xff] }
  0x9d   :  { %591 = vmatpush2.msra.mxu0 %v432_v62  ;;  %v637_v62 = vld [vmem:[#allocation11] sm:$0xff] }
  0x9e   :  { %592 = vmatprep.subr.mxu0 %v431_v63  ;;  %v700_v63 = vld [vmem:[#allocation11 + $0x1f8] sm:$0xff] }
  0x9f   :  { %593 = vmatpush2.msra.mxu0 %v430_v0  ;;  %v699_v0 = vld [vmem:[#allocation11 + $0x1f0] sm:$0xff] }
  0xa0   :  { %594 = vmatprep.subr.mxu0 %v429_v2  ;;  %v698_v2 = vld [vmem:[#allocation11 + $0x1e8] sm:$0xff] }
  0xa1   :  { %595 = vmatpush2.msra.mxu0 %v428_v3  ;;  %v697_v3 = vld [vmem:[#allocation11 + $0x1e0] sm:$0xff] }
  0xa2   :  { %596 = vmatprep.subr.mxu0 %v427_v23  ;;  %v679_v23 = vld [vmem:[#allocation11 + $0x150] sm:$0xff] }
  0xa3   :  { %597 = vmatpush2.msra.mxu0 %v426_v24  ;;  %v295_v24 = vld [vmem:[%s1233_s5] sm:$0x3] }
  0xa4   :  { %598 = vmatprep.subr.mxu0 %v425_v1  ;;  %v300_v25 = vrot.slane %v295_v24, %v1199_v6  ;;  %v304_v1 = vrot.slane %v295_v24, %v1201_v8 }
  0xa5   :  { %599 = vmatpush2.msra.mxu0 %v424_v26 }
  0xa6   :  { %600 = vmatprep.subr.mxu0 %v423_v27 }
  0xa7   :  { %601 = vmatpush2.msra.mxu0 %v422_v28 }
  0xa8   :  { %602 = vmatprep.subr.mxu0 %v421_v29 }
  0xa9   :  { %603 = vmatpush2.msra.mxu0 %v420_v30 }
 0x112   :  { %v216_v11 = vpop.f32.mrf.mxu0 }
 0x113   :  { %v217_v12 = vadd.f32 %v216_v11, %v136_v9  ;;  %v691_v11 = vld [vmem:[#allocation11 + $0x1b0] sm:$0xff] }
 0x114   :  { %v218_v13 = vpop.f32.mrf.mxu0 }
 0x115   :  { %v219_v14 = vadd.f32 %v218_v13, %v140_v10  ;;  %v227_v17 = vmax.f32 %v217_v12, 0.0  ;;  %v690_v12 = vld [vmem:[#allocation11 + $0x1a8] sm:$0xff]  ;;  %v689_v13 = vld [vmem:[#allocation11 + $0x1a0] sm:$0xff] }
 0x116   :  { %v222_v15 = vpop.f32.mrf.mxu0 }
 0x117   :  { %v228_v16 = vmax.f32 %v219_v14, 0.0  ;;  %v223_v18 = vadd.f32 %v222_v15, %v136_v9  ;;  %v693_v9 = vld [vmem:[#allocation11 + $0x1c0] sm:$0xff]  ;;  %v688_v14 = vld [vmem:[#allocation11 + $0x198] sm:$0xff]  ;;  %v687_v15 = vld [vmem:[#allocation11 + $0x190] sm:$0xff] }
 0x118   :  { %v224_v19 = vpop.f32.mrf.mxu0 }
 0x119   :  { %v225_v20 = vadd.f32 %v224_v19, %v140_v10  ;;  %371 = vmatprep.mubr.f32.mxu1 %v228_v16  ;;  %v229_v22 = vmax.f32 %v223_v18, 0.0  ;;  %v692_v10 = vld [vmem:[#allocation11 + $0x1b8] sm:$0xff]  ;;  %v686_v16 = vld [vmem:[#allocation11 + $0x188] sm:$0xff]  ;;  %v683_v19 = vld [vmem:[#allocation11 + $0x170] sm:$0xff] }
 0x11a   :  { %372 = vmatmul.mubr.f32.vlgmr.msra.gmra.mxu1 %v227_v17  ;;  %v685_v17 = vld [vmem:[#allocation11 + $0x180] sm:$0xff]  ;;  %v684_v18 = vld [vmem:[#allocation11 + $0x178] sm:$0xff] }
 0x11b   :  { %v230_v21 = vmax.f32 %v225_v20, 0.0  ;;  %714 = vmatpush1.msra.mxu1 %v667_v32  ;;  %v682_v20 = vld [vmem:[#allocation11 + $0x168] sm:$0xff] }
 0x11c   :  { %715 = vmatprep.subr.mxu1 %v666_v33 }
 0x11d   :  { %377 = vmatprep.mubr.f32.mxu1 %v230_v21  ;;  %716 = vmatpush1.msra.mxu1 %v665_v34  ;;  %v681_v21 = vld [vmem:[#allocation11 + $0x160] sm:$0xff] }
 0x11e   :  { %378 = vmatmul.mubr.f32.gmra.mxu1 %v229_v22  ;;  %717 = vmatprep.subr.mxu1 %v664_v35  ;;  %v680_v22 = vld [vmem:[#allocation11 + $0x158] sm:$0xff] }
 0x11f   :  { %718 = vmatpush1.msra.mxu1 %v663_v36 }
 0x120   :  { %719 = vmatprep.subr.mxu1 %v662_v37 }
 0x121   :  { %720 = vmatpush1.msra.mxu1 %v661_v38  ;;  %v678_v38 = vld [vmem:[#allocation11 + $0x148] sm:$0xff] }
 0x122   :  { %721 = vmatprep.subr.mxu1 %v660_v39  ;;  %v677_v39 = vld [vmem:[#allocation11 + $0x140] sm:$0xff] }
 0x123   :  { %722 = vmatpush1.msra.mxu1 %v659_v40  ;;  %v676_v40 = vld [vmem:[#allocation11 + $0x138] sm:$0xff] }
 0x124   :  { %723 = vmatprep.subr.mxu1 %v658_v41  ;;  %v675_v41 = vld [vmem:[#allocation11 + $0x130] sm:$0xff] }
 0x125   :  { %724 = vmatpush1.msra.mxu1 %v657_v42  ;;  %v674_v42 = vld [vmem:[#allocation11 + $0x128] sm:$0xff] }
 0x126   :  { %725 = vmatprep.subr.mxu1 %v656_v43  ;;  %v673_v43 = vld [vmem:[#allocation11 + $0x120] sm:$0xff] }
 0x127   :  { %726 = vmatpush1.msra.mxu1 %v655_v44  ;;  %v672_v44 = vld [vmem:[#allocation11 + $0x118] sm:$0xff] }
 0x128   :  { %727 = vmatprep.subr.mxu1 %v654_v45  ;;  %v671_v45 = vld [vmem:[#allocation11 + $0x110] sm:$0xff] }
 0x129   :  { %728 = vmatpush1.msra.mxu1 %v653_v46  ;;  %v670_v46 = vld [vmem:[#allocation11 + $0x108] sm:$0xff] }
 0x12a   :  { %729 = vmatprep.subr.mxu1 %v652_v47  ;;  %v669_v47 = vld [vmem:[#allocation11 + $0x100] sm:$0xff] }
 0x12b   :  { %730 = vmatpush1.msra.mxu1 %v651_v48  ;;  %v529_v48 = vpop.f32.mrf.mxu0 }
 0x12c   :  { %731 = vmatprep.subr.mxu1 %v650_v49 }
 0x12d   :  { %732 = vmatpush1.msra.mxu1 %v649_v50  ;;  %v531_v49 = vpop.f32.mrf.mxu0 }
 0x12e   :  { %733 = vmatprep.subr.mxu1 %v648_v51  ;;  %v617_v51 = vld [vmem:[%s1236_s8] sm:$0x3] }
 0x12f   :  { %734 = vmatpush1.msra.mxu1 %v647_v52 }
 0x130   :  { %735 = vmatprep.subr.mxu1 %v646_v53 }
 0x131   :  { %736 = vmatpush1.msra.mxu1 %v645_v54  ;;  %v622_v54 = vrot.slane %v617_v51, %v1199_v6 }
 0x132   :  { %737 = vmatprep.subr.mxu1 %v644_v55 }
 0x133   :  { %738 = vmatpush1.msra.mxu1 %v643_v56  ;;  %v626_v56 = vrot.slane %v617_v51, %v1201_v8 }
 0x134   :  { %739 = vmatprep.subr.mxu1 %v642_v57 }
 0x135   :  { %740 = vmatpush1.msra.mxu1 %v641_v58 }
 0x136   :  { %741 = vmatprep.subr.mxu1 %v640_v59 }
 0x137   :  { %742 = vmatpush1.msra.mxu1 %v639_v60 }
 0x138   :  { %743 = vmatprep.subr.mxu1 %v638_v61 }
 0x139   :  { %744 = vmatpush1.msra.mxu1 %v637_v62 }
 0x13a   :  { %745 = vmatprep.subr.mxu1 %v700_v63 }
 0x13b   :  { %746 = vmatpush2.msra.mxu1 %v699_v0 }
 0x13c   :  { %747 = vmatprep.subr.mxu1 %v698_v2 }
 0x13d   :  { %748 = vmatpush2.msra.mxu1 %v697_v3 }
 0x13e   :  { %749 = vmatprep.subr.mxu1 %v696_v4 }
 0x13f   :  { %750 = vmatpush2.msra.mxu1 %v695_v5 }
 0x140   :  { %751 = vmatprep.subr.mxu1 %v694_v7 }
 0x141   :  { %752 = vmatpush2.msra.mxu1 %v693_v9 }
 0x142   :  { %753 = vmatprep.subr.mxu1 %v692_v10  ;;  %v795_v10 = vld [vmem:[#allocation12 + $0x8] sm:$0xff] }
 0x143   :  { %754 = vmatpush2.msra.mxu1 %v691_v11  ;;  %v866_v11 = vld [vmem:[#allocation2] sm:$0x1] }
 0x144   :  { %755 = vmatprep.subr.mxu1 %v690_v12  ;;  %v1072_v12 = vmov 0  }
 0x145   :  { %756 = vmatpush2.msra.mxu1 %v689_v13  ;;  %912 = vset.pattern.permute.xlu0 %v1072_v12 }
 0x146   :  { %757 = vmatprep.subr.mxu1 %v688_v14  ;;  %869 = vperm.xlu0 %912, %v866_v11   ;;  %v701_v14 = vld [vmem:[%s1238_s10] sm:$0x3]  ;;  %s1073_s10 = smov [#allocation14]  }
 0x147   :  { %758 = vmatpush2.msra.mxu1 %v687_v15  ;;  %s885_s28 = sshll.u32 %s1073_s10, 4  ;;  %s886_s28 = int_to_ptr.vmem [resolvable:$true] %s885_s28 }
 0x148   :  { %759 = vmatprep.subr.mxu1 %v686_v16  ;;  %v710_v16 = vrot.slane %v701_v14, %v1201_v8  ;;  %s1033_s29 = scalar_lea.vmem %s886_s28, 16  ;;  %s1037_s30 = scalar_lea.vmem %s886_s28, 32 }
 0x149   :  { %760 = vmatpush2.msra.mxu1 %v685_v17  ;;  %v706_v17 = vrot.slane %v701_v14, %v1199_v6  ;;  %p1034_p2 = scmp.ne.s32.totalorder %s886_s28, %s1033_s29  ;;  %p1038_p3 = scmp.lt.s32.totalorder %s886_s28, %s886_s28 }
 0x14a   :  { %761 = vmatprep.subr.mxu1 %v684_v18  ;;  %p1039_p4 = scmp.lt.s32.totalorder %s1037_s30, %s1033_s29 }
 0x14b   :  { %762 = vmatpush2.msra.mxu1 %v683_v19 }
 0x14c   :  { %763 = vmatprep.subr.mxu1 %v682_v20  ;;  %p1040_p5 = por %p1039_p4, %p1038_p3 }
 0x14d   :  { %764 = vmatpush2.msra.mxu1 %v681_v21 }
 0x14e   :  { %765 = vmatprep.subr.mxu1 %v680_v22  ;;  %p1041_p6 = pnand %p1040_p5, %p1034_p2 }
 0x14f   :  { %766 = vmatpush2.msra.mxu1 %v679_v23 }
 0x150   :  { %767 = vmatprep.subr.mxu1 %v678_v38 }
 0x151   :  { %768 = vmatpush2.msra.mxu1 %v677_v39 }
 0x152   :  { %769 = vmatprep.subr.mxu1 %v676_v40  ;;  %v535_v50 = vpop.f32.mrf.mxu0 }
 0x153   :  { %770 = vmatpush2.msra.mxu1 %v675_v41 }
 0x154   :  { %771 = vmatprep.subr.mxu1 %v674_v42  ;;  %v537_v52 = vpop.f32.mrf.mxu0 }
 0x155   :  { %772 = vmatpush2.msra.mxu1 %v673_v43 }
 0x156   :  { %773 = vmatprep.subr.mxu1 %v672_v44 }
 0x157   :  { %774 = vmatpush2.msra.mxu1 %v671_v45 }
 0x158   :  { %775 = vmatprep.subr.mxu1 %v670_v46 }
 0x159   :  { %776 = vmatpush2.msra.mxu1 %v669_v47 }
 0x1da   :  { %v373_v26 = vpop.f32.mrf.mxu1 }
 0x1db   :  { %v374_v27 = vadd.f32 %v373_v26, %v300_v25 }
 0x1dc   :  { %v375_v28 = vpop.f32.mrf.mxu1 }
 0x1dd   :  { %v376_v29 = vadd.f32 %v375_v28, %v304_v1  ;;  %v384_v32 = vmax.f32 %v374_v27, 0.0  ;;  %v794_v27 = vld [vmem:[#allocation12] sm:$0xff]  ;;  %v870_v28 = vpop.permute.xlu0 %869 }
 0x1de   :  { %v379_v30 = vpop.f32.mrf.mxu1  ;;  %v875_v8 = vrot.slane %v870_v28, %v1199_v6 }
 0x1df   :  { %v385_v31 = vmax.f32 %v376_v29, 0.0  ;;  %v380_v33 = vadd.f32 %v379_v30, %v300_v25 }
 0x1e0   :  { %v381_v34 = vpop.f32.mrf.mxu1 }
 0x1e1   :  { %v382_v35 = vadd.f32 %v381_v34, %v304_v1  ;;  %604 = vmatprep.mubr.f32.mxu0 %v385_v31  ;;  %v386_v37 = vmax.f32 %v380_v33, 0.0 }
 0x1e2   :  { %605 = vmatmul.mubr.f32.vlgmr.msra.gmra.mxu0 %v384_v32 }
 0x1e3   :  { %v387_v36 = vmax.f32 %v382_v35, 0.0 }
 0x1e5   :  { %610 = vmatprep.mubr.f32.mxu0 %v387_v36 }
 0x1e6   :  { %611 = vmatmul.mubr.f32.gmra.mxu0 %v386_v37 }
 0x1e7   :  { %860 = vmatprep.mubr.f32.mxu0 %v795_v10 }
 0x2a2   :  { %v606_v53 = vpop.f32.mrf.mxu0 }
 0x2a3   :  { %v607_v55 = vadd.f32 %v606_v53, %v529_v48 }
 0x2a4   :  { %v608_v57 = vpop.f32.mrf.mxu0 }
 0x2a5   :  { %v609_v58 = vadd.f32 %v608_v57, %v531_v49  ;;  %v629_v59 = vadd.f32 %v622_v54, %v607_v55 }
 0x2a6   :  { %v612_v60 = vpop.f32.mrf.mxu0 }
 0x2a7   :  { %v630_v61 = vadd.f32 %v626_v56, %v609_v58  ;;  %v613_v62 = vadd.f32 %v612_v60, %v535_v50  ;;  %v633_v3 = vmax.f32 %v629_v59, 0.0 }
 0x2a8   :  { %v614_v63 = vpop.f32.mrf.mxu0 }
 0x2a9   :  { %v634_v0 = vmax.f32 %v630_v61, 0.0  ;;  %v615_v2 = vadd.f32 %v614_v63, %v537_v52  ;;  %v631_v4 = vadd.f32 %v622_v54, %v613_v62 }
 0x2ab   :  { %v632_v5 = vadd.f32 %v626_v56, %v615_v2  ;;  %777 = vmatprep.mubr.f32.mxu1 %v634_v0  ;;  %v635_v9 = vmax.f32 %v631_v4, 0.0 }
 0x2ac   :  { %778 = vmatmul.mubr.f32.vlgmr.msra.gmra.mxu1 %v633_v3 }
 0x2ad   :  { %v636_v7 = vmax.f32 %v632_v5, 0.0 }
 0x2af   :  { %783 = vmatprep.mubr.f32.mxu1 %v636_v7 }
 0x2b0   :  { %784 = vmatmul.mubr.f32.gmra.mxu1 %v635_v9 }
 0x36c   :  { %v779_v13 = vpop.f32.mrf.mxu1 }
 0x36d   :  { %v780_v24 = vadd.f32 %v779_v13, %v706_v17 }
 0x36e   :  { %v781_v15 = vpop.f32.mrf.mxu1 }
 0x36f   :  { %v782_v21 = vadd.f32 %v781_v15, %v710_v16  ;;  %v790_v26 = vmax.f32 %v780_v24, 0.0 }
 0x370   :  { %v785_v18 = vpop.f32.mrf.mxu1 }
 0x371   :  { %v786_v19 = vadd.f32 %v785_v18, %v706_v17  ;;  %v791_v1 = vmax.f32 %v782_v21, 0.0 }
 0x372   :  { %v787_v20 = vpop.f32.mrf.mxu1 }
 0x373   :  { %v788_v22 = vadd.f32 %v787_v20, %v710_v16  ;;  %v792_v25 = vmax.f32 %v786_v19, 0.0 }
 0x375   :  { %v793_v23 = vmax.f32 %v788_v22, 0.0 }
 0x377   :  { %824 = vmatprep.subr.mxu0 %v793_v23 }
 0x378   :  { %825 = vmatpush1.xpose.msra.mxu0 %v792_v25 }
 0x379   :  { %826 = vmatprep.subr.mxu0 %v791_v1 }
 0x37c   :  { %827 = vmatpush1.xpose.msra.mxu0 %v790_v26 }
 0x37f   :  { %861 = vmatmul.mubr.f32.vlgmr.msra.gmra.mxu0 %v794_v27 }
 0x43f   :  { %v862_v29 = vpop.f32.mrf.mxu0 }
 0x440   :  { %v876_v30 = vadd.f32 %v875_v8, %v862_v29 }
 0x441   :  { %v864_v31 = vpop.f32.mrf.mxu0 }
 0x442   :  { %878 = vst.msk [vmem:[#allocation14] sm:$0x1] %vm877_vm2, %v876_v30 }
 0x443   :  { %1044 = shalt.err (!%p1041_p6)
}
 0x444   :  { %888 = dma.vmem_to_hbm [thread:$0]  %s886_s28, 16, %s1241_s13, [#allocation5]  }
 0x445   :  { %1061 = dma.done.wait [#allocation5], 16  }
 0x446   :  { %1062 = vsyncadd [#allocation5], 4294967280 }
 0x447   :  { %892 = vsyncpa [#allocation4], 1 }
 0x448   :  { %893 = vsyncpa [#allocation7], 1 }
 0x449   :  { %894 = vsyncpa [#allocation10], 1 }
 0x44a   :  { %895 = vsyncpa [#allocation13], 1 }
 0x44b   :  { %896 = vsyncpa [#allocation5], 1 }

</bundles_post_ra>
